<compile_context>
chip_gen: v7x
topology: tpu7x:2x2x1
jax: 0.10.0
libtpu: 0.0.40
codegen_flags: <defaults>
</compile_context>

<pallas_src>
import functools

import jax
import jax.numpy as jnp
from jax.experimental import pallas as pl
from jax.experimental.pallas import tpu as pltpu


def _recurrence(proj_ref, whh_ref, out_ref, h0, seq_len):
    """Serial part only: h <- tanh(proj[t] + h @ W_hh^T); out[t] <- h."""
    # Invariant weight loaded once, outside the serial loop (16 vregs, bf16).
    whh = whh_ref[...]

    def step(t, h):
        # Per-step serial chain: bf16 cast -> single-pass MXU matmul with f32
        # accumulation -> f32 add -> tanh (EUP).  h never touches VMEM.
        h_new = jnp.tanh(
            proj_ref[t]
            + jnp.dot(h.astype(jnp.bfloat16), whh,
                      preferred_element_type=jnp.float32))
        out_ref[t] = h_new
        return h_new

    # Fully unrolled: short, static trip count -> LLO overlaps the tanh / EUP
    # and the output store of step t with the MXU matmul of step t+1.
    jax.lax.fori_loop(0, seq_len, step, h0, unroll=True)


def rnn_seq_kernel_zero_h0(proj_ref, whh_ref, out_ref, *, seq_len, batch_p,
                           hidden_size):
    h0 = jnp.zeros((batch_p, hidden_size), jnp.float32)
    _recurrence(proj_ref, whh_ref, out_ref, h0, seq_len)


def rnn_seq_kernel_with_h0(proj_ref, whh_ref, h0_ref, out_ref, *, seq_len):
    _recurrence(proj_ref, whh_ref, out_ref, h0_ref[...], seq_len)


def rnn_forward_pallas(x_seq, emb_table, W_ih, b_ih, W_hh, b_hh, hidden=None):
    """x_seq: (seq_len, batch) int32.  Returns (seq_len, batch, hidden) f32."""
    seq_len, batch = x_seq.shape
    hidden_size = W_hh.shape[0]

    # Hoist embedding + input linear + both biases out of the recurrence:
    # proj_table[v] = emb[v] @ W_ih^T + b_ih + b_hh   (vocab, H), then gather.
    proj_table = (emb_table.astype(jnp.float32) @ W_ih.T.astype(jnp.float32)
                  + b_ih.astype(jnp.float32) + b_hh.astype(jnp.float32))
    proj = jnp.take(proj_table, x_seq.astype(jnp.int32), axis=0)  # (S, B, H)

    # Pad batch to a sublane multiple (8): full-sublane stores, full MXU rows.
    batch_p = max(8, -(-batch // 8) * 8)
    if batch_p != batch:
        proj = jnp.pad(proj, ((0, 0), (0, batch_p - batch), (0, 0)))

    # W_hh^T pre-transposed and pre-cast to bf16: kernel does h @ W_hh^T with
    # bf16 operands and f32 accumulation (single MXU pass).
    whh_t = W_hh.T.astype(jnp.bfloat16)  # (H, H)

    vmem_spec = pl.BlockSpec(memory_space=pltpu.MemorySpace.VMEM)
    out_shape = jax.ShapeDtypeStruct((seq_len, batch_p, hidden_size),
                                     jnp.float32)

    cost = pl.CostEstimate(
        flops=2 * seq_len * batch_p * hidden_size * hidden_size,
        transcendentals=seq_len * batch_p * hidden_size,
        bytes_accessed=(proj.size * 4 + whh_t.size * 2
                        + seq_len * batch_p * hidden_size * 4),
    )

    if hidden is None:
        out = pl.pallas_call(
            functools.partial(rnn_seq_kernel_zero_h0, seq_len=seq_len,
                              batch_p=batch_p, hidden_size=hidden_size),
            out_shape=out_shape,
            in_specs=[vmem_spec, vmem_spec],
            out_specs=pl.BlockSpec(memory_space=pltpu.MemorySpace.VMEM),
            cost_estimate=cost,
        )(proj, whh_t)
    else:
        h0 = hidden.astype(jnp.float32)
        if batch_p != batch:
            h0 = jnp.pad(h0, ((0, batch_p - batch), (0, 0)))
        out = pl.pallas_call(
            functools.partial(rnn_seq_kernel_with_h0, seq_len=seq_len),
            out_shape=out_shape,
            in_specs=[vmem_spec, vmem_spec, vmem_spec],
            out_specs=pl.BlockSpec(memory_space=pltpu.MemorySpace.VMEM),
            cost_estimate=cost,
        )(proj, whh_t, h0)

    return out[:, :batch, :]


def rnn_forward_ref_f32(x_seq, emb_table, W_ih, b_ih, W_hh, b_hh, hidden=None):
    """Pure-JAX f32 reference replicating the PyTorch forward exactly."""
    embedded = jnp.take(emb_table, x_seq.astype(jnp.int32), axis=0)
    batch = x_seq.shape[1]
    h0 = (jnp.zeros((batch, W_hh.shape[0]), jnp.float32)
          if hidden is None else hidden.astype(jnp.float32))

    def step(h, x_t):
        h_new = jnp.tanh(x_t @ W_ih.T + b_ih + h @ W_hh.T + b_hh)
        return h_new, h_new

    _, hs = jax.lax.scan(step, h0, embedded)
    return hs


def rnn_forward_ref_bf16(x_seq, emb_table, W_ih, b_ih, W_hh, b_hh,
                         hidden=None):
    """Reference mirroring the kernel's bf16-operand / f32-accumulate matmul."""
    proj_table = (emb_table.astype(jnp.float32) @ W_ih.T.astype(jnp.float32)
                  + b_ih.astype(jnp.float32) + b_hh.astype(jnp.float32))
    proj = jnp.take(proj_table, x_seq.astype(jnp.int32), axis=0)
    batch = x_seq.shape[1]
    whh_t = W_hh.T.astype(jnp.bfloat16)
    h0 = (jnp.zeros((batch, W_hh.shape[0]), jnp.float32)
          if hidden is None else hidden.astype(jnp.float32))

    def step(h, p_t):
        h_new = jnp.tanh(p_t + jnp.dot(h.astype(jnp.bfloat16), whh_t,
                                       preferred_element_type=jnp.float32))
        return h_new, h_new

    _, hs = jax.lax.scan(step, h0, proj)
    return hs


if __name__ == "__main__":
    # Small shapes consistent with the module's forward.
    vocab_size = 28          # len(LETTRES) + 2
    embedding_dim = 64
    hidden_size = 128
    seq_len = 8
    batch = 4

    key = jax.random.PRNGKey(0)
    k_emb, k_wih, k_bih, k_whh, k_bhh, k_x, k_h0 = jax.random.split(key, 7)

    emb_table = jax.random.normal(k_emb, (vocab_size, embedding_dim),
                                  jnp.float32) * 0.1
    W_ih = jax.random.normal(k_wih, (hidden_size, embedding_dim),
                             jnp.float32) * 0.1
    b_ih = jax.random.normal(k_bih, (hidden_size,), jnp.float32) * 0.1
    W_hh = jax.random.normal(k_whh, (hidden_size, hidden_size),
                             jnp.float32) * 0.1
    b_hh = jax.random.normal(k_bhh, (hidden_size,), jnp.float32) * 0.1

    x_seq = jax.random.randint(k_x, (seq_len, batch), 0, vocab_size, jnp.int32)

    # --- Default path (hidden=None, zero-initialized in kernel). ---
    out = rnn_forward_pallas(x_seq, emb_table, W_ih, b_ih, W_hh, b_hh)
    out = jax.block_until_ready(out)
    assert out.shape == (seq_len, batch, hidden_size)

    # Tight check against a reference with identical bf16-matmul numerics.
    ref_b = rnn_forward_ref_bf16(x_seq, emb_table, W_ih, b_ih, W_hh, b_hh)
    assert jnp.allclose(out, ref_b, atol=1e-3, rtol=1e-3)
    # Loose check against the exact f32 PyTorch-equivalent recurrence
    # (tolerance widened because the kernel's matmul operands are bf16).
    ref_f = rnn_forward_ref_f32(x_seq, emb_table, W_ih, b_ih, W_hh, b_hh)
    assert jnp.allclose(out, ref_f, atol=5e-2, rtol=5e-2)

    # --- Explicit initial hidden state path. ---
    h_init = jax.random.normal(k_h0, (batch, hidden_size), jnp.float32) * 0.1
    out_h = rnn_forward_pallas(x_seq, emb_table, W_ih, b_ih, W_hh, b_hh, h_init)
    out_h = jax.block_until_ready(out_h)
    ref_bh = rnn_forward_ref_bf16(x_seq, emb_table, W_ih, b_ih, W_hh, b_hh,
                                  h_init)
    assert jnp.allclose(out_h, ref_bh, atol=1e-3, rtol=1e-3)
    ref_fh = rnn_forward_ref_f32(x_seq, emb_table, W_ih, b_ih, W_hh, b_hh,
                                 h_init)
    assert jnp.allclose(out_h, ref_fh, atol=5e-2, rtol=5e-2)

    print("KERNEL_OK")
</pallas_src>

<mosaic_0001>
module attributes {stable_mosaic.version = 11 : i64} {
  func.func @rnn_seq_kernel_zero_h0(%arg0: memref<8x8x128xf32, #tpu.memory_space<vmem>>, %arg1: memref<128x128xbf16, #tpu.memory_space<vmem>>, %arg2: memref<8x8x128xf32, #tpu.memory_space<vmem>>) attributes {dimension_semantics = [], scalar_prefetch = 0 : i64, scratch_operands = 0 : i64, tpu.core_type = #tpu.core_type<tc>} {
    %cst = arith.constant 0.000000e+00 : f32
    %0 = vector.broadcast %cst : f32 to vector<8x128xf32>
    %c0 = arith.constant 0 : index
    %c0_0 = arith.constant 0 : index
    %1 = vector.load %arg1[%c0, %c0_0] : memref<128x128xbf16, #tpu.memory_space<vmem>>, vector<128x128xbf16>
    %c0_i32 = arith.constant 0 : i32
    %2 = arith.index_cast %c0_i32 : i32 to index
    %c0_1 = arith.constant 0 : index
    %c0_2 = arith.constant 0 : index
    %3 = vector.load %arg0[%2, %c0_1, %c0_2] : memref<8x8x128xf32, #tpu.memory_space<vmem>>, vector<1x8x128xf32>
    %4 = vector.shape_cast %3 : vector<1x8x128xf32> to vector<8x128xf32>
    %5 = arith.truncf %0 : vector<8x128xf32> to vector<8x128xbf16>
    %cst_3 = arith.constant dense<0.000000e+00> : vector<8x128xf32>
    %6 = tpu.matmul %5, %1, %cst_3 {dimension_numbers = #tpu.dot_dimension_numbers<[1], [0], [0], [1], [0, 0, 1, 1], [], []>} : vector<8x128xbf16>, vector<128x128xbf16>, vector<8x128xf32> -> vector<8x128xf32>
    %7 = arith.addf %4, %6 : vector<8x128xf32>
    %8 = math.tanh %7 : vector<8x128xf32>
    %9 = arith.index_cast %c0_i32 : i32 to index
    %c0_4 = arith.constant 0 : index
    %c0_5 = arith.constant 0 : index
    %10 = vector.load %arg2[%9, %c0_4, %c0_5] : memref<8x8x128xf32, #tpu.memory_space<vmem>>, vector<1x8x128xf32>
    %11 = vector.shape_cast %10 : vector<1x8x128xf32> to vector<8x128xf32>
    %12 = vector.shape_cast %8 : vector<8x128xf32> to vector<1x8x128xf32>
    tpu.vector_store %arg2[%9, %c0_4, %c0_5], %12 {strides = array<i32>} : memref<8x8x128xf32, #tpu.memory_space<vmem>>, vector<1x8x128xf32>,
    %c1_i32 = arith.constant 1 : i32
    %13 = arith.index_cast %c1_i32 : i32 to index
    %c0_6 = arith.constant 0 : index
    %c0_7 = arith.constant 0 : index
    %14 = vector.load %arg0[%13, %c0_6, %c0_7] : memref<8x8x128xf32, #tpu.memory_space<vmem>>, vector<1x8x128xf32>
    %15 = vector.shape_cast %14 : vector<1x8x128xf32> to vector<8x128xf32>
    %16 = arith.truncf %8 : vector<8x128xf32> to vector<8x128xbf16>
    %cst_8 = arith.constant dense<0.000000e+00> : vector<8x128xf32>
    %17 = tpu.matmul %16, %1, %cst_8 {dimension_numbers = #tpu.dot_dimension_numbers<[1], [0], [0], [1], [0, 0, 1, 1], [], []>} : vector<8x128xbf16>, vector<128x128xbf16>, vector<8x128xf32> -> vector<8x128xf32>
    %18 = arith.addf %15, %17 : vector<8x128xf32>
    %19 = math.tanh %18 : vector<8x128xf32>
    %20 = arith.index_cast %c1_i32 : i32 to index
    %c0_9 = arith.constant 0 : index
    %c0_10 = arith.constant 0 : index
    %21 = vector.load %arg2[%20, %c0_9, %c0_10] : memref<8x8x128xf32, #tpu.memory_space<vmem>>, vector<1x8x128xf32>
    %22 = vector.shape_cast %21 : vector<1x8x128xf32> to vector<8x128xf32>
    %23 = vector.shape_cast %19 : vector<8x128xf32> to vector<1x8x128xf32>
    tpu.vector_store %arg2[%20, %c0_9, %c0_10], %23 {strides = array<i32>} : memref<8x8x128xf32, #tpu.memory_space<vmem>>, vector<1x8x128xf32>,
    %c2_i32 = arith.constant 2 : i32
    %24 = arith.index_cast %c2_i32 : i32 to index
    %c0_11 = arith.constant 0 : index
    %c0_12 = arith.constant 0 : index
    %25 = vector.load %arg0[%24, %c0_11, %c0_12] : memref<8x8x128xf32, #tpu.memory_space<vmem>>, vector<1x8x128xf32>
    %26 = vector.shape_cast %25 : vector<1x8x128xf32> to vector<8x128xf32>
    %27 = arith.truncf %19 : vector<8x128xf32> to vector<8x128xbf16>
    %cst_13 = arith.constant dense<0.000000e+00> : vector<8x128xf32>
    %28 = tpu.matmul %27, %1, %cst_13 {dimension_numbers = #tpu.dot_dimension_numbers<[1], [0], [0], [1], [0, 0, 1, 1], [], []>} : vector<8x128xbf16>, vector<128x128xbf16>, vector<8x128xf32> -> vector<8x128xf32>
    %29 = arith.addf %26, %28 : vector<8x128xf32>
    %30 = math.tanh %29 : vector<8x128xf32>
    %31 = arith.index_cast %c2_i32 : i32 to index
    %c0_14 = arith.constant 0 : index
    %c0_15 = arith.constant 0 : index
    %32 = vector.load %arg2[%31, %c0_14, %c0_15] : memref<8x8x128xf32, #tpu.memory_space<vmem>>, vector<1x8x128xf32>
    %33 = vector.shape_cast %32 : vector<1x8x128xf32> to vector<8x128xf32>
    %34 = vector.shape_cast %30 : vector<8x128xf32> to vector<1x8x128xf32>
    tpu.vector_store %arg2[%31, %c0_14, %c0_15], %34 {strides = array<i32>} : memref<8x8x128xf32, #tpu.memory_space<vmem>>, vector<1x8x128xf32>,
    %c3_i32 = arith.constant 3 : i32
    %35 = arith.index_cast %c3_i32 : i32 to index
    %c0_16 = arith.constant 0 : index
    %c0_17 = arith.constant 0 : index
    %36 = vector.load %arg0[%35, %c0_16, %c0_17] : memref<8x8x128xf32, #tpu.memory_space<vmem>>, vector<1x8x128xf32>
    %37 = vector.shape_cast %36 : vector<1x8x128xf32> to vector<8x128xf32>
    %38 = arith.truncf %30 : vector<8x128xf32> to vector<8x128xbf16>
    %cst_18 = arith.constant dense<0.000000e+00> : vector<8x128xf32>
    %39 = tpu.matmul %38, %1, %cst_18 {dimension_numbers = #tpu.dot_dimension_numbers<[1], [0], [0], [1], [0, 0, 1, 1], [], []>} : vector<8x128xbf16>, vector<128x128xbf16>, vector<8x128xf32> -> vector<8x128xf32>
    %40 = arith.addf %37, %39 : vector<8x128xf32>
    %41 = math.tanh %40 : vector<8x128xf32>
    %42 = arith.index_cast %c3_i32 : i32 to index
    %c0_19 = arith.constant 0 : index
    %c0_20 = arith.constant 0 : index
    %43 = vector.load %arg2[%42, %c0_19, %c0_20] : memref<8x8x128xf32, #tpu.memory_space<vmem>>, vector<1x8x128xf32>
    %44 = vector.shape_cast %43 : vector<1x8x128xf32> to vector<8x128xf32>
    %45 = vector.shape_cast %41 : vector<8x128xf32> to vector<1x8x128xf32>
    tpu.vector_store %arg2[%42, %c0_19, %c0_20], %45 {strides = array<i32>} : memref<8x8x128xf32, #tpu.memory_space<vmem>>, vector<1x8x128xf32>,
    %c4_i32 = arith.constant 4 : i32
    %46 = arith.index_cast %c4_i32 : i32 to index
    %c0_21 = arith.constant 0 : index
    %c0_22 = arith.constant 0 : index
    %47 = vector.load %arg0[%46, %c0_21, %c0_22] : memref<8x8x128xf32, #tpu.memory_space<vmem>>, vector<1x8x128xf32>
    %48 = vector.shape_cast %47 : vector<1x8x128xf32> to vector<8x128xf32>
    %49 = arith.truncf %41 : vector<8x128xf32> to vector<8x128xbf16>
    %cst_23 = arith.constant dense<0.000000e+00> : vector<8x128xf32>
    %50 = tpu.matmul %49, %1, %cst_23 {dimension_numbers = #tpu.dot_dimension_numbers<[1], [0], [0], [1], [0, 0, 1, 1], [], []>} : vector<8x128xbf16>, vector<128x128xbf16>, vector<8x128xf32> -> vector<8x128xf32>
    %51 = arith.addf %48, %50 : vector<8x128xf32>
    %52 = math.tanh %51 : vector<8x128xf32>
    %53 = arith.index_cast %c4_i32 : i32 to index
    %c0_24 = arith.constant 0 : index
    %c0_25 = arith.constant 0 : index
    %54 = vector.load %arg2[%53, %c0_24, %c0_25] : memref<8x8x128xf32, #tpu.memory_space<vmem>>, vector<1x8x128xf32>
    %55 = vector.shape_cast %54 : vector<1x8x128xf32> to vector<8x128xf32>
    %56 = vector.shape_cast %52 : vector<8x128xf32> to vector<1x8x128xf32>
    tpu.vector_store %arg2[%53, %c0_24, %c0_25], %56 {strides = array<i32>} : memref<8x8x128xf32, #tpu.memory_space<vmem>>, vector<1x8x128xf32>,
    %c5_i32 = arith.constant 5 : i32
    %57 = arith.index_cast %c5_i32 : i32 to index
    %c0_26 = arith.constant 0 : index
    %c0_27 = arith.constant 0 : index
    %58 = vector.load %arg0[%57, %c0_26, %c0_27] : memref<8x8x128xf32, #tpu.memory_space<vmem>>, vector<1x8x128xf32>
    %59 = vector.shape_cast %58 : vector<1x8x128xf32> to vector<8x128xf32>
    %60 = arith.truncf %52 : vector<8x128xf32> to vector<8x128xbf16>
    %cst_28 = arith.constant dense<0.000000e+00> : vector<8x128xf32>
    %61 = tpu.matmul %60, %1, %cst_28 {dimension_numbers = #tpu.dot_dimension_numbers<[1], [0], [0], [1], [0, 0, 1, 1], [], []>} : vector<8x128xbf16>, vector<128x128xbf16>, vector<8x128xf32> -> vector<8x128xf32>
    %62 = arith.addf %59, %61 : vector<8x128xf32>
    %63 = math.tanh %62 : vector<8x128xf32>
    %64 = arith.index_cast %c5_i32 : i32 to index
    %c0_29 = arith.constant 0 : index
    %c0_30 = arith.constant 0 : index
    %65 = vector.load %arg2[%64, %c0_29, %c0_30] : memref<8x8x128xf32, #tpu.memory_space<vmem>>, vector<1x8x128xf32>
    %66 = vector.shape_cast %65 : vector<1x8x128xf32> to vector<8x128xf32>
    %67 = vector.shape_cast %63 : vector<8x128xf32> to vector<1x8x128xf32>
    tpu.vector_store %arg2[%64, %c0_29, %c0_30], %67 {strides = array<i32>} : memref<8x8x128xf32, #tpu.memory_space<vmem>>, vector<1x8x128xf32>,
    %c6_i32 = arith.constant 6 : i32
    %68 = arith.index_cast %c6_i32 : i32 to index
    %c0_31 = arith.constant 0 : index
    %c0_32 = arith.constant 0 : index
    %69 = vector.load %arg0[%68, %c0_31, %c0_32] : memref<8x8x128xf32, #tpu.memory_space<vmem>>, vector<1x8x128xf32>
    %70 = vector.shape_cast %69 : vector<1x8x128xf32> to vector<8x128xf32>
    %71 = arith.truncf %63 : vector<8x128xf32> to vector<8x128xbf16>
    %cst_33 = arith.constant dense<0.000000e+00> : vector<8x128xf32>
    %72 = tpu.matmul %71, %1, %cst_33 {dimension_numbers = #tpu.dot_dimension_numbers<[1], [0], [0], [1], [0, 0, 1, 1], [], []>} : vector<8x128xbf16>, vector<128x128xbf16>, vector<8x128xf32> -> vector<8x128xf32>
    %73 = arith.addf %70, %72 : vector<8x128xf32>
    %74 = math.tanh %73 : vector<8x128xf32>
    %75 = arith.index_cast %c6_i32 : i32 to index
    %c0_34 = arith.constant 0 : index
    %c0_35 = arith.constant 0 : index
    %76 = vector.load %arg2[%75, %c0_34, %c0_35] : memref<8x8x128xf32, #tpu.memory_space<vmem>>, vector<1x8x128xf32>
    %77 = vector.shape_cast %76 : vector<1x8x128xf32> to vector<8x128xf32>
    %78 = vector.shape_cast %74 : vector<8x128xf32> to vector<1x8x128xf32>
    tpu.vector_store %arg2[%75, %c0_34, %c0_35], %78 {strides = array<i32>} : memref<8x8x128xf32, #tpu.memory_space<vmem>>, vector<1x8x128xf32>,
    %c7_i32 = arith.constant 7 : i32
    %79 = arith.index_cast %c7_i32 : i32 to index
    %c0_36 = arith.constant 0 : index
    %c0_37 = arith.constant 0 : index
    %80 = vector.load %arg0[%79, %c0_36, %c0_37] : memref<8x8x128xf32, #tpu.memory_space<vmem>>, vector<1x8x128xf32>
    %81 = vector.shape_cast %80 : vector<1x8x128xf32> to vector<8x128xf32>
    %82 = arith.truncf %74 : vector<8x128xf32> to vector<8x128xbf16>
    %cst_38 = arith.constant dense<0.000000e+00> : vector<8x128xf32>
    %83 = tpu.matmul %82, %1, %cst_38 {dimension_numbers = #tpu.dot_dimension_numbers<[1], [0], [0], [1], [0, 0, 1, 1], [], []>} : vector<8x128xbf16>, vector<128x128xbf16>, vector<8x128xf32> -> vector<8x128xf32>
    %84 = arith.addf %81, %83 : vector<8x128xf32>
    %85 = math.tanh %84 : vector<8x128xf32>
    %86 = arith.index_cast %c7_i32 : i32 to index
    %c0_39 = arith.constant 0 : index
    %c0_40 = arith.constant 0 : index
    %87 = vector.load %arg2[%86, %c0_39, %c0_40] : memref<8x8x128xf32, #tpu.memory_space<vmem>>, vector<1x8x128xf32>
    %88 = vector.shape_cast %87 : vector<1x8x128xf32> to vector<8x128xf32>
    %89 = vector.shape_cast %85 : vector<8x128xf32> to vector<1x8x128xf32>
    tpu.vector_store %arg2[%86, %c0_39, %c0_40], %89 {strides = array<i32>} : memref<8x8x128xf32, #tpu.memory_space<vmem>>, vector<1x8x128xf32>,
    %c8_i32 = arith.constant 8 : i32
    return
  }
}

</mosaic_0001>

<bundles_post_ra>
// kernel: tpu_custom_call.1
= control target key start
LH: loop header
LB: loop body
LE: loop exit
PB: predicated region body
PF: predicated region fallthrough
CT: control target
= control target key end

     0   :  { %7 = vsyncpa [#allocation3], 0  ;;  %s1069_s0 = inlined_call_operand.hbm [shape: f32[8,8,128], index: 0, kind: input, shape index: {}]   ;;  %s1070_s1 = inlined_call_operand.hbm [shape: bf16[128,128], index: 1, kind: input, shape index: {}]   ;;  %s1071_s2 = inlined_call_operand.hbm [shape: f32[8,8,128], index: 2, kind: output, shape index: {}]  }
   0x1   :  { %8 = vsyncpa [#allocation6], 0 }
   0x2   :  { %9 = vsyncpa [#allocation4], 0  ;;  %s842_s9 = smov [#allocation2]   ;;  %s770_s13 = scalar_lea.hbm %s1069_s0, 1024 }
   0x3   :  { %s15_s10 = sshll.u32 %s842_s9, 4  ;;  %p771_p0 = scmp.ne.s32.totalorder %s1069_s0, %s770_s13  ;;  %s16_s10 = int_to_ptr.vmem [resolvable:$true] %s15_s10 }
   0x4   :  { %p774_p1 = scmp.lt.u32.totalorder %s770_s13, %s1069_s0 }
   0x6   :  { %p776_p2 = pnand %p774_p1, %p771_p0 }
   0x8   :  { %779 = shalt.err (!%p776_p2)
}
   0x9   :  { %s780_s18 = scalar_lea.vmem %s16_s10, 1024  ;;  %p785_p4 = scmp.lt.s32.totalorder %s16_s10, %s16_s10 }
   0xa   :  { %p781_p3 = scmp.ne.s32.totalorder %s16_s10, %s780_s18  ;;  %p786_p5 = scmp.lt.s32.totalorder %s780_s18, %s780_s18 }
   0xc   :  { %p787_p6 = por %p786_p5, %p785_p4 }
   0xe   :  { %p788_p7 = pnand %p787_p6, %p781_p3 }
  0x10   :  { %791 = shalt.err (!%p788_p7)
}
  0x11   :  { %s843_s19 = smov 128   ;;  %s844_s20 = smov 8  }
  0x12   :  { %21 = dma.hbm_to_vmem [thread:$0]  %s1069_s0, 1024, %s16_s10, [#allocation3], %s843_s19, %s843_s19, %s844_s20  }
  0x13   :  { %s845_s23 = smov [#allocation5]   ;;  %s792_s27 = scalar_lea.hbm %s1070_s1, 1024 }
  0x14   :  { %s27_s24 = sshll.u32 %s845_s23, 4  ;;  %p793_p8 = scmp.ne.s32.totalorder %s1070_s1, %s792_s27  ;;  %s28_s24 = int_to_ptr.vmem [resolvable:$true] %s27_s24 }
  0x15   :  { %p796_p9 = scmp.lt.u32.totalorder %s792_s27, %s1070_s1 }
  0x17   :  { %p798_p10 = pnand %p796_p9, %p793_p8 }
  0x19   :  { %801 = shalt.err (!%p798_p10)
}
  0x1a   :  { %s802_s4 = scalar_lea.vmem %s28_s24, 1024  ;;  %p807_p12 = scmp.lt.s32.totalorder %s28_s24, %s28_s24 }
  0x1b   :  { %p803_p11 = scmp.ne.s32.totalorder %s28_s24, %s802_s4  ;;  %p808_p13 = scmp.lt.s32.totalorder %s802_s4, %s802_s4 }
  0x1d   :  { %p809_p0 = por %p808_p13, %p807_p12 }
  0x1f   :  { %p810_p1 = pnand %p809_p0, %p803_p11 }
  0x21   :  { %813 = shalt.err (!%p810_p1)
}
  0x22   :  { %s846_s0 = smov 64   ;;  %s847_s5 = smov 4  }
  0x23   :  { %33 = dma.hbm_to_vmem [thread:$0]  %s1070_s1, 1024, %s28_s24, [#allocation6], %s846_s0, %s846_s0, %s847_s5  }
  0x24   :  { %836 = dma.done.wait [#allocation3], 1024  }
  0x25   :  { %837 = vsyncadd [#allocation3], 4294966272 }
  0x26   :  { %838 = dma.done.wait [#allocation6], 1024  }
  0x27   :  { %839 = vsyncadd [#allocation6], 4294966272  ;;  %v848_v0 = vmov 0.0   ;;  %vm849_vm0 = vmmov 0   ;;  %v900_v1 = vld [vmem:[#allocation5] sm:$0xff]   ;;  %v903_v2 = vld [vmem:[#allocation5 + $0x8] sm:$0xff]  }
  0x28   :  { %576 = vmatprep.subr.bf16.mxu0 %v848_v0  ;;  %592 = vmatprep.mubr.msk.bf16.mxu0 %vm849_vm0, %v848_v0  ;;  %v909_v3 = vld [vmem:[#allocation5 + $0x10] sm:$0xff]   ;;  %v915_v4 = vld [vmem:[#allocation5 + $0x18] sm:$0xff]   ;;  %v921_v5 = vld [vmem:[#allocation5 + $0x20] sm:$0xff]   ;;  %v850_v9 = vmov 0   ;;  %s851_s1 = smov [#allocation7]  }
  0x29   :  { %596 = vmatprep.subr.bf16.mxu1 %v848_v0  ;;  %612 = vmatprep.mubr.msk.bf16.mxu1 %vm849_vm0, %v848_v0  ;;  %v927_v6 = vld [vmem:[#allocation5 + $0x28] sm:$0xff]   ;;  %v933_v7 = vld [vmem:[#allocation5 + $0x30] sm:$0xff]   ;;  %v939_v8 = vld [vmem:[#allocation5 + $0x38] sm:$0xff]   ;;  %s483_s8 = sshll.u32 %s851_s1, 4  ;;  %s484_s8 = int_to_ptr.vmem [resolvable:$true] %s483_s8 }
  0x2a   :  { %577 = vmatpush3.bf16.msra.mxu0 %v900_v1  ;;  %597 = vmatpush3.bf16.msra.mxu1 %v900_v1  ;;  %v57_v10 = vld [vmem:[#allocation2] sm:$0xff]  ;;  %v150_v18 = vld [vmem:[#allocation2 + $0x8] sm:$0xff]  ;;  %v197_v26 = vld [vmem:[#allocation2 + $0x10] sm:$0xff]  ;;  %s814_s9 = scalar_lea.vmem %s484_s8, 1024  ;;  %p819_p3 = scmp.lt.s32.totalorder %s484_s8, %s484_s8 }
  0x2b   :  { %578 = vmatprep.subr.bf16.mxu0 %v848_v0  ;;  %598 = vmatprep.subr.bf16.mxu1 %v848_v0  ;;  %v244_v34 = vld [vmem:[#allocation2 + $0x18] sm:$0xff]  ;;  %v291_v42 = vld [vmem:[#allocation2 + $0x20] sm:$0xff]  ;;  %v338_v50 = vld [vmem:[#allocation2 + $0x28] sm:$0xff]  ;;  %p815_p2 = scmp.ne.s32.totalorder %s484_s8, %s814_s9  ;;  %p820_p4 = scmp.lt.s32.totalorder %s814_s9, %s814_s9 }
  0x2c   :  { %v385_v58 = vld [vmem:[#allocation2 + $0x30] sm:$0xff] }
  0x2d   :  { %p821_p5 = por %p820_p4, %p819_p3 }
  0x2e   :  { %579 = vmatpush3.bf16.msra.mxu0 %v903_v2  ;;  %599 = vmatpush3.bf16.msra.mxu1 %v903_v2 }
  0x2f   :  { %580 = vmatprep.subr.bf16.mxu0 %v848_v0  ;;  %600 = vmatprep.subr.bf16.mxu1 %v848_v0  ;;  %p822_p6 = pnand %p821_p5, %p815_p2 }
  0x32   :  { %581 = vmatpush3.bf16.msra.mxu0 %v909_v3  ;;  %601 = vmatpush3.bf16.msra.mxu1 %v909_v3 }
  0x33   :  { %582 = vmatprep.subr.bf16.mxu0 %v848_v0  ;;  %602 = vmatprep.subr.bf16.mxu1 %v848_v0 }
  0x36   :  { %583 = vmatpush3.bf16.msra.mxu0 %v915_v4  ;;  %603 = vmatpush3.bf16.msra.mxu1 %v915_v4 }
  0x37   :  { %584 = vmatprep.subr.bf16.mxu0 %v848_v0  ;;  %604 = vmatprep.subr.bf16.mxu1 %v848_v0 }
  0x3a   :  { %585 = vmatpush3.bf16.msra.mxu0 %v921_v5  ;;  %605 = vmatpush3.bf16.msra.mxu1 %v921_v5 }
  0x3b   :  { %586 = vmatprep.subr.bf16.mxu0 %v848_v0  ;;  %606 = vmatprep.subr.bf16.mxu1 %v848_v0 }
  0x3e   :  { %587 = vmatpush3.bf16.msra.mxu0 %v927_v6  ;;  %607 = vmatpush3.bf16.msra.mxu1 %v927_v6 }
  0x3f   :  { %588 = vmatprep.subr.bf16.mxu0 %v848_v0  ;;  %608 = vmatprep.subr.bf16.mxu1 %v848_v0 }
  0x42   :  { %589 = vmatpush3.bf16.msra.mxu0 %v933_v7  ;;  %609 = vmatpush3.bf16.msra.mxu1 %v933_v7 }
  0x43   :  { %590 = vmatprep.subr.bf16.mxu0 %v848_v0  ;;  %610 = vmatprep.subr.bf16.mxu1 %v848_v0 }
  0x46   :  { %591 = vmatpush3.bf16.msra.mxu0 %v939_v8  ;;  %611 = vmatpush3.bf16.msra.mxu1 %v939_v8 }
  0x47   :  { %616 = vmatprep.subr.bf16.mxu0 %v848_v0  ;;  %636 = vmatprep.subr.bf16.mxu1 %v848_v0 }
  0x49   :  { %593 = vmatmul.mubr.bf16.vlgmr.msra.gmra.mrb[0].mxu0 %v850_v9 }
  0x4a   :  { %617 = vmatpush3.bf16.msra.mxu0 %v900_v1  ;;  %632 = vmatprep.mubr.msk.bf16.mxu0 %vm849_vm0, %v848_v0 }
  0x4b   :  { %618 = vmatprep.subr.bf16.mxu0 %v848_v0 }
  0x4e   :  { %619 = vmatpush3.bf16.msra.mxu0 %v903_v2 }
  0x4f   :  { %620 = vmatprep.subr.bf16.mxu0 %v848_v0 }
  0x52   :  { %621 = vmatpush3.bf16.msra.mxu0 %v909_v3 }
  0x53   :  { %622 = vmatprep.subr.bf16.mxu0 %v848_v0 }
  0x56   :  { %623 = vmatpush3.bf16.msra.mxu0 %v915_v4 }
  0x57   :  { %624 = vmatprep.subr.bf16.mxu0 %v848_v0 }
  0x5a   :  { %625 = vmatpush3.bf16.msra.mxu0 %v921_v5 }
  0x5b   :  { %626 = vmatprep.subr.bf16.mxu0 %v848_v0 }
  0x5e   :  { %627 = vmatpush3.bf16.msra.mxu0 %v927_v6 }
  0x5f   :  { %628 = vmatprep.subr.bf16.mxu0 %v848_v0 }
  0x62   :  { %629 = vmatpush3.bf16.msra.mxu0 %v933_v7 }
  0x63   :  { %630 = vmatprep.subr.bf16.mxu0 %v848_v0 }
  0x66   :  { %631 = vmatpush3.bf16.msra.mxu0 %v939_v8 }
  0x67   :  { %656 = vmatprep.subr.bf16.mxu0 %v848_v0 }
 0x11c   :  { %v140_v11 = vpop.f32.mrb[0].mxu0 }
 0x11d   :  { %v146_v12 = vadd.f32 %v140_v11, %v57_v10  ;;  %v594_v13 = vpop.f32.mrb[1].mxu0 }
 0x11e   :  { %v143_v14 = vpop.f32.mrb[2].mxu0 }
 0x11f   :  { %754 = vtanh.f32 %v146_v12  ;;  %v595_v15 = vpop.f32.mrb[3].mxu0 }
 0x129   :  { %v755_v16 = vpop.eup %754 }
 0x12a   :  { %148 = vst [vmem:[#allocation7] sm:$0xff] %v755_v16  ;;  %v151_v17 = vpack.c.bf16 %v755_v16, %v755_v16 }
 0x12c   :  { %613 = vmatmul.mubr.bf16.vlgmr.msra.gmra.mrb[0].mxu1 %v151_v17 }
 0x12d   :  { %637 = vmatpush3.bf16.msra.mxu1 %v900_v1  ;;  %652 = vmatprep.mubr.msk.bf16.mxu1 %vm849_vm0, %v848_v0 }
 0x12e   :  { %638 = vmatprep.subr.bf16.mxu1 %v848_v0 }
 0x131   :  { %639 = vmatpush3.bf16.msra.mxu1 %v903_v2 }
 0x132   :  { %640 = vmatprep.subr.bf16.mxu1 %v848_v0 }
 0x135   :  { %641 = vmatpush3.bf16.msra.mxu1 %v909_v3 }
 0x136   :  { %642 = vmatprep.subr.bf16.mxu1 %v848_v0 }
 0x139   :  { %643 = vmatpush3.bf16.msra.mxu1 %v915_v4 }
 0x13a   :  { %644 = vmatprep.subr.bf16.mxu1 %v848_v0 }
 0x13d   :  { %645 = vmatpush3.bf16.msra.mxu1 %v921_v5 }
 0x13e   :  { %646 = vmatprep.subr.bf16.mxu1 %v848_v0 }
 0x141   :  { %647 = vmatpush3.bf16.msra.mxu1 %v927_v6 }
 0x142   :  { %648 = vmatprep.subr.bf16.mxu1 %v848_v0 }
 0x145   :  { %649 = vmatpush3.bf16.msra.mxu1 %v933_v7 }
 0x146   :  { %650 = vmatprep.subr.bf16.mxu1 %v848_v0 }
 0x149   :  { %651 = vmatpush3.bf16.msra.mxu1 %v939_v8 }
 0x14a   :  { %676 = vmatprep.subr.bf16.mxu1 %v848_v0 }
 0x1ff   :  { %v186_v19 = vpop.f32.mrb[0].mxu1 }
 0x200   :  { %v192_v20 = vadd.f32 %v186_v19, %v150_v18  ;;  %v614_v21 = vpop.f32.mrb[1].mxu1 }
 0x201   :  { %v189_v22 = vpop.f32.mrb[2].mxu1 }
 0x202   :  { %756 = vtanh.f32 %v192_v20  ;;  %v615_v23 = vpop.f32.mrb[3].mxu1 }
 0x20c   :  { %v757_v24 = vpop.eup %756 }
 0x20d   :  { %195 = vst [vmem:[#allocation7 + $0x8] sm:$0xff] %v757_v24  ;;  %v198_v25 = vpack.c.bf16 %v757_v24, %v757_v24 }
 0x20f   :  { %633 = vmatmul.mubr.bf16.vlgmr.msra.gmra.mrb[4].mxu0 %v198_v25 }
 0x210   :  { %657 = vmatpush3.bf16.msra.mxu0 %v900_v1  ;;  %672 = vmatprep.mubr.msk.bf16.mxu0 %vm849_vm0, %v848_v0 }
 0x211   :  { %658 = vmatprep.subr.bf16.mxu0 %v848_v0 }
 0x214   :  { %659 = vmatpush3.bf16.msra.mxu0 %v903_v2 }
 0x215   :  { %660 = vmatprep.subr.bf16.mxu0 %v848_v0 }
 0x218   :  { %661 = vmatpush3.bf16.msra.mxu0 %v909_v3 }
 0x219   :  { %662 = vmatprep.subr.bf16.mxu0 %v848_v0 }
 0x21c   :  { %663 = vmatpush3.bf16.msra.mxu0 %v915_v4 }
 0x21d   :  { %664 = vmatprep.subr.bf16.mxu0 %v848_v0 }
 0x220   :  { %665 = vmatpush3.bf16.msra.mxu0 %v921_v5 }
 0x221   :  { %666 = vmatprep.subr.bf16.mxu0 %v848_v0 }
 0x224   :  { %667 = vmatpush3.bf16.msra.mxu0 %v927_v6 }
 0x225   :  { %668 = vmatprep.subr.bf16.mxu0 %v848_v0 }
 0x228   :  { %669 = vmatpush3.bf16.msra.mxu0 %v933_v7 }
 0x229   :  { %670 = vmatprep.subr.bf16.mxu0 %v848_v0 }
 0x22c   :  { %671 = vmatpush3.bf16.msra.mxu0 %v939_v8 }
 0x22d   :  { %696 = vmatprep.subr.bf16.mxu0 %v848_v0 }
 0x2e2   :  { %v233_v27 = vpop.f32.mrb[4].mxu0 }
 0x2e3   :  { %v239_v28 = vadd.f32 %v233_v27, %v197_v26  ;;  %v634_v29 = vpop.f32.mrb[5].mxu0 }
 0x2e4   :  { %v236_v30 = vpop.f32.mrb[6].mxu0 }
 0x2e5   :  { %758 = vtanh.f32 %v239_v28  ;;  %v635_v31 = vpop.f32.mrb[7].mxu0 }
 0x2ef   :  { %v759_v32 = vpop.eup %758 }
 0x2f0   :  { %242 = vst [vmem:[#allocation7 + $0x10] sm:$0xff] %v759_v32  ;;  %v245_v33 = vpack.c.bf16 %v759_v32, %v759_v32 }
 0x2f2   :  { %653 = vmatmul.mubr.bf16.vlgmr.msra.gmra.mrb[4].mxu1 %v245_v33 }
 0x2f3   :  { %677 = vmatpush3.bf16.msra.mxu1 %v900_v1  ;;  %692 = vmatprep.mubr.msk.bf16.mxu1 %vm849_vm0, %v848_v0 }
 0x2f4   :  { %678 = vmatprep.subr.bf16.mxu1 %v848_v0 }
 0x2f7   :  { %679 = vmatpush3.bf16.msra.mxu1 %v903_v2 }
 0x2f8   :  { %680 = vmatprep.subr.bf16.mxu1 %v848_v0 }
 0x2fb   :  { %681 = vmatpush3.bf16.msra.mxu1 %v909_v3 }
 0x2fc   :  { %682 = vmatprep.subr.bf16.mxu1 %v848_v0 }
 0x2ff   :  { %683 = vmatpush3.bf16.msra.mxu1 %v915_v4 }
 0x300   :  { %684 = vmatprep.subr.bf16.mxu1 %v848_v0 }
 0x303   :  { %685 = vmatpush3.bf16.msra.mxu1 %v921_v5 }
 0x304   :  { %686 = vmatprep.subr.bf16.mxu1 %v848_v0 }
 0x307   :  { %687 = vmatpush3.bf16.msra.mxu1 %v927_v6 }
 0x308   :  { %688 = vmatprep.subr.bf16.mxu1 %v848_v0 }
 0x30b   :  { %689 = vmatpush3.bf16.msra.mxu1 %v933_v7 }
 0x30c   :  { %690 = vmatprep.subr.bf16.mxu1 %v848_v0 }
 0x30f   :  { %691 = vmatpush3.bf16.msra.mxu1 %v939_v8 }
 0x310   :  { %716 = vmatprep.subr.bf16.mxu1 %v848_v0 }
 0x3c5   :  { %v280_v35 = vpop.f32.mrb[4].mxu1 }
 0x3c6   :  { %v286_v36 = vadd.f32 %v280_v35, %v244_v34  ;;  %v654_v37 = vpop.f32.mrb[5].mxu1 }
 0x3c7   :  { %v283_v38 = vpop.f32.mrb[6].mxu1 }
 0x3c8   :  { %760 = vtanh.f32 %v286_v36  ;;  %v655_v39 = vpop.f32.mrb[7].mxu1 }
 0x3d2   :  { %v761_v40 = vpop.eup %760 }
 0x3d3   :  { %289 = vst [vmem:[#allocation7 + $0x18] sm:$0xff] %v761_v40  ;;  %v292_v41 = vpack.c.bf16 %v761_v40, %v761_v40 }
 0x3d5   :  { %673 = vmatmul.mubr.bf16.vlgmr.msra.gmra.mrb[8].mxu0 %v292_v41 }
 0x3d6   :  { %697 = vmatpush3.bf16.msra.mxu0 %v900_v1  ;;  %712 = vmatprep.mubr.msk.bf16.mxu0 %vm849_vm0, %v848_v0 }
 0x3d7   :  { %698 = vmatprep.subr.bf16.mxu0 %v848_v0 }
 0x3da   :  { %699 = vmatpush3.bf16.msra.mxu0 %v903_v2 }
 0x3db   :  { %700 = vmatprep.subr.bf16.mxu0 %v848_v0 }
 0x3de   :  { %701 = vmatpush3.bf16.msra.mxu0 %v909_v3 }
 0x3df   :  { %702 = vmatprep.subr.bf16.mxu0 %v848_v0 }
 0x3e2   :  { %703 = vmatpush3.bf16.msra.mxu0 %v915_v4 }
 0x3e3   :  { %704 = vmatprep.subr.bf16.mxu0 %v848_v0 }
 0x3e6   :  { %705 = vmatpush3.bf16.msra.mxu0 %v921_v5 }
 0x3e7   :  { %706 = vmatprep.subr.bf16.mxu0 %v848_v0 }
 0x3ea   :  { %707 = vmatpush3.bf16.msra.mxu0 %v927_v6 }
 0x3eb   :  { %708 = vmatprep.subr.bf16.mxu0 %v848_v0 }
 0x3ee   :  { %709 = vmatpush3.bf16.msra.mxu0 %v933_v7 }
 0x3ef   :  { %710 = vmatprep.subr.bf16.mxu0 %v848_v0 }
 0x3f2   :  { %711 = vmatpush3.bf16.msra.mxu0 %v939_v8 }
 0x4a8   :  { %v327_v43 = vpop.f32.mrb[8].mxu0 }
 0x4a9   :  { %v333_v44 = vadd.f32 %v327_v43, %v291_v42  ;;  %v674_v45 = vpop.f32.mrb[9].mxu0 }
 0x4aa   :  { %v330_v46 = vpop.f32.mrb[10].mxu0 }
 0x4ab   :  { %762 = vtanh.f32 %v333_v44  ;;  %v675_v47 = vpop.f32.mrb[11].mxu0 }
 0x4b5   :  { %v763_v48 = vpop.eup %762 }
 0x4b6   :  { %336 = vst [vmem:[#allocation7 + $0x20] sm:$0xff] %v763_v48  ;;  %v339_v49 = vpack.c.bf16 %v763_v48, %v763_v48 }
 0x4b8   :  { %693 = vmatmul.mubr.bf16.vlgmr.msra.gmra.mrb[8].mxu1 %v339_v49 }
 0x4b9   :  { %717 = vmatpush3.bf16.msra.mxu1 %v900_v1  ;;  %732 = vmatprep.mubr.msk.bf16.mxu1 %vm849_vm0, %v848_v0 }
 0x4ba   :  { %718 = vmatprep.subr.bf16.mxu1 %v848_v0 }
 0x4bd   :  { %719 = vmatpush3.bf16.msra.mxu1 %v903_v2  ;;  %v432_v2 = vld [vmem:[#allocation2 + $0x38] sm:$0xff] }
 0x4be   :  { %720 = vmatprep.subr.bf16.mxu1 %v848_v0 }
 0x4c1   :  { %721 = vmatpush3.bf16.msra.mxu1 %v909_v3 }
 0x4c2   :  { %722 = vmatprep.subr.bf16.mxu1 %v848_v0 }
 0x4c5   :  { %723 = vmatpush3.bf16.msra.mxu1 %v915_v4 }
 0x4c6   :  { %724 = vmatprep.subr.bf16.mxu1 %v848_v0 }
 0x4c9   :  { %725 = vmatpush3.bf16.msra.mxu1 %v921_v5 }
 0x4ca   :  { %726 = vmatprep.subr.bf16.mxu1 %v848_v0 }
 0x4cd   :  { %727 = vmatpush3.bf16.msra.mxu1 %v927_v6 }
 0x4ce   :  { %728 = vmatprep.subr.bf16.mxu1 %v848_v0 }
 0x4d1   :  { %729 = vmatpush3.bf16.msra.mxu1 %v933_v7 }
 0x4d2   :  { %730 = vmatprep.subr.bf16.mxu1 %v848_v0 }
 0x4d5   :  { %731 = vmatpush3.bf16.msra.mxu1 %v939_v8 }
 0x58b   :  { %v374_v51 = vpop.f32.mrb[8].mxu1 }
 0x58c   :  { %v380_v52 = vadd.f32 %v374_v51, %v338_v50  ;;  %v694_v53 = vpop.f32.mrb[9].mxu1 }
 0x58d   :  { %v377_v54 = vpop.f32.mrb[10].mxu1 }
 0x58e   :  { %764 = vtanh.f32 %v380_v52  ;;  %v695_v55 = vpop.f32.mrb[11].mxu1 }
 0x598   :  { %v765_v56 = vpop.eup %764 }
 0x599   :  { %383 = vst [vmem:[#allocation7 + $0x28] sm:$0xff] %v765_v56  ;;  %v386_v57 = vpack.c.bf16 %v765_v56, %v765_v56 }
 0x59b   :  { %713 = vmatmul.mubr.bf16.vlgmr.msra.gmra.mrb[12].mxu0 %v386_v57 }
 0x66e   :  { %v421_v59 = vpop.f32.mrb[12].mxu0 }
 0x66f   :  { %v427_v60 = vadd.f32 %v421_v59, %v385_v58  ;;  %v714_v61 = vpop.f32.mrb[13].mxu0 }
 0x670   :  { %v424_v62 = vpop.f32.mrb[14].mxu0 }
 0x671   :  { %766 = vtanh.f32 %v427_v60  ;;  %v715_v63 = vpop.f32.mrb[15].mxu0 }
 0x67b   :  { %v767_v0 = vpop.eup %766 }
 0x67c   :  { %430 = vst [vmem:[#allocation7 + $0x30] sm:$0xff] %v767_v0  ;;  %v433_v1 = vpack.c.bf16 %v767_v0, %v767_v0 }
 0x67e   :  { %733 = vmatmul.mubr.bf16.vlgmr.msra.gmra.mrb[12].mxu1 %v433_v1 }
 0x751   :  { %v468_v3 = vpop.f32.mrb[12].mxu1 }
 0x752   :  { %v474_v4 = vadd.f32 %v468_v3, %v432_v2  ;;  %v734_v5 = vpop.f32.mrb[13].mxu1 }
 0x753   :  { %v471_v6 = vpop.f32.mrb[14].mxu1 }
 0x754   :  { %768 = vtanh.f32 %v474_v4  ;;  %v735_v7 = vpop.f32.mrb[15].mxu1 }
 0x75e   :  { %v769_v8 = vpop.eup %768 }
 0x75f   :  { %477 = vst [vmem:[#allocation7 + $0x38] sm:$0xff] %v769_v8 }
 0x760   :  { %825 = shalt.err (!%p822_p6)
}
 0x761   :  { %s826_s12 = scalar_lea.hbm %s1071_s2, 1024 }
 0x762   :  { %p827_p7 = scmp.ne.s32.totalorder %s1071_s2, %s826_s12  ;;  %p830_p8 = scmp.lt.u32.totalorder %s826_s12, %s1071_s2 }
 0x764   :  { %p832_p9 = pnand %p830_p8, %p827_p7 }
 0x766   :  { %835 = shalt.err (!%p832_p9)
}
 0x767   :  { %489 = dma.vmem_to_hbm [thread:$0]  %s484_s8, 1024, %s1071_s2, [#allocation4], %s843_s19, %s843_s19, %s844_s20  }
 0x768   :  { %840 = dma.done.wait [#allocation4], 1024  }
 0x769   :  { %841 = vsyncadd [#allocation4], 4294966272 }
 0x76a   :  { %493 = vsyncpa [#allocation3], 1 }
 0x76b   :  { %494 = vsyncpa [#allocation6], 1 }
 0x76c   :  { %495 = vsyncpa [#allocation4], 1 }

</bundles_post_ra>
